<compile_context>
chip_gen: v6e
topology: v6e:2x2x1
jax: 0.10.0
libtpu: 0.0.40
codegen_flags: <defaults>
</compile_context>

<pallas_src>
import functools

import jax
import jax.numpy as jnp
import numpy as np
from jax.experimental import pallas as pl
from jax.experimental.pallas import tpu as pltpu

OUT_PAD = 128  # lane-dense output slab width (>= a_nvals + 1)


def _round_up(x, m):
    return ((x + m - 1) // m) * m


def _ac_fused_kernel(x_ref, w1_ref, b1_ref, w2_ref, b2_ref, out_ref, *, a_nvals):
    x = x_ref[...]                                                   # [TB, S]

    # Fused first layer: actor hidden in columns [:H], critic hidden in [H:2H].
    h = jnp.dot(x, w1_ref[...], preferred_element_type=jnp.float32) + b1_ref[...]
    h = jnp.maximum(h, 0.0)                                          # ReLU, [TB, 2H]

    # Fused second layer: logits in lanes [0:A], critic value in lane A,
    # exact zeros in padding lanes (weights/biases zero-padded in the wrapper).
    f = jnp.dot(h, w2_ref[...], preferred_element_type=jnp.float32) + b2_ref[...]

    # Numerically stable log-softmax restricted to the logit lanes (VPU mask,
    # exp on EUP, lane reduce on XLU -- all off the MXU slot).
    lane = jax.lax.broadcasted_iota(jnp.int32, f.shape, 1)
    is_logit = lane < a_nvals
    m = jnp.max(jnp.where(is_logit, f, -jnp.inf), axis=-1, keepdims=True)
    z = f - m
    e = jnp.where(is_logit, jnp.exp(z), 0.0)
    lse = jnp.log(jnp.sum(e, axis=-1, keepdims=True))
    logp = z - lse

    # Lanes [0:A] <- log-probs; lane A keeps the raw critic value; padding lanes keep f(=0).
    out_ref[...] = jnp.where(is_logit, logp, f)


def fuse_params(params):
    """One-time fusion of actor/critic weights into lane-dense matrices.

    Returns w1f [S, 2H], b1f [1, 2H], w2f [2H, OUT_PAD], b2f [1, OUT_PAD].
    Logits occupy output lanes [0:A], the critic value lane A, zeros elsewhere.
    """
    wa1, ba1 = params["wa1"], params["ba1"]   # [S, H], [1, H]
    wc1, bc1 = params["wc1"], params["bc1"]   # [S, H], [1, H]
    wa2, ba2 = params["wa2"], params["ba2"]   # [H, A], [1, A]
    wc2, bc2 = params["wc2"], params["bc2"]   # [H, 1], [1, 1]

    S, H = wa1.shape
    A = wa2.shape[1]
    assert A + 1 <= OUT_PAD, "a_nvals + 1 must fit in the 128-lane output slab"

    w1f = jnp.concatenate([wa1, wc1], axis=1)                         # [S, 2H]
    b1f = jnp.concatenate([ba1, bc1], axis=1)                         # [1, 2H]

    w2f = jnp.zeros((2 * H, OUT_PAD), jnp.float32)
    w2f = w2f.at[:H, :A].set(wa2)                                     # actor half -> logits
    w2f = w2f.at[H:, A].set(wc2[:, 0])                                # critic half -> value lane
    b2f = jnp.zeros((1, OUT_PAD), jnp.float32)
    b2f = b2f.at[0, :A].set(ba2[0])
    b2f = b2f.at[0, A].set(bc2[0, 0])

    return dict(w1f=w1f, b1f=b1f, w2f=w2f, b2f=b2f, a_nvals=A)


@functools.partial(jax.jit, static_argnames=("a_nvals", "block_b"))
def _forward_impl(state, w1f, b1f, w2f, b2f, *, a_nvals, block_b):
    B, S = state.shape
    A = a_nvals
    H2 = w1f.shape[1]

    # Batch tile: multiple of 8 (f32 sublane), capped by block_b so large rollout
    # batches stream through the pipeline instead of blowing VMEM.
    tb = min(block_b, _round_up(B, 8))
    b_pad = _round_up(B, tb)
    if b_pad != B:
        state = jnp.pad(state, ((0, b_pad - B), (0, 0)))

    kernel = functools.partial(_ac_fused_kernel, a_nvals=A)

    out = pl.pallas_call(
        kernel,
        out_shape=jax.ShapeDtypeStruct((b_pad, OUT_PAD), jnp.float32),
        grid_spec=pl.GridSpec(
            grid=(b_pad // tb,),
            in_specs=[
                pl.BlockSpec((tb, S), lambda i: (i, 0)),          # state tile, pipelined
                pl.BlockSpec((S, H2), lambda i: (0, 0)),          # fused W1, VMEM-resident
                pl.BlockSpec((1, H2), lambda i: (0, 0)),          # fused b1, resident
                pl.BlockSpec((H2, OUT_PAD), lambda i: (0, 0)),    # fused W2, resident
                pl.BlockSpec((1, OUT_PAD), lambda i: (0, 0)),     # fused b2, resident
            ],
            out_specs=pl.BlockSpec((tb, OUT_PAD), lambda i: (i, 0)),
        ),
        compiler_params=pltpu.CompilerParams(
            dimension_semantics=("parallel",)),                    # 2-TC sharding on v7x
    )(state, w1f, b1f, w2f, b2f)

    logp = out[:B, :A]
    value = out[:B, A:A + 1]
    return logp, value


def actor_critic_forward(state, fused, *, block_b=1024):
    """state: [B, S] float32; fused: output of fuse_params().
    Returns (log_probs [B, A], value [B, 1])."""
    return _forward_impl(state, fused["w1f"], fused["b1f"], fused["w2f"], fused["b2f"],
                         a_nvals=int(fused["a_nvals"]), block_b=block_b)


def init_params(key, s_nvals, a_nvals, hidden_size=32):
    """Deterministic init matching the PyTorch module's parameter shapes
    (stored transposed: [in, out])."""
    ks = jax.random.split(key, 8)

    def lin(kw, kb, fan_in, fan_out):
        bound = 1.0 / np.sqrt(fan_in)
        w = jax.random.uniform(kw, (fan_in, fan_out), jnp.float32, -bound, bound)
        b = jax.random.uniform(kb, (1, fan_out), jnp.float32, -bound, bound)
        return w, b

    wa1, ba1 = lin(ks[0], ks[1], s_nvals, hidden_size)
    wa2, ba2 = lin(ks[2], ks[3], hidden_size, a_nvals)
    wc1, bc1 = lin(ks[4], ks[5], s_nvals, hidden_size)
    wc2, bc2 = lin(ks[6], ks[7], hidden_size, 1)
    return dict(wa1=wa1, ba1=ba1, wa2=wa2, ba2=ba2,
                wc1=wc1, bc1=bc1, wc2=wc2, bc2=bc2)


def _reference(state, p):
    ha = jnp.maximum(state @ p["wa1"] + p["ba1"], 0.0)
    logits = ha @ p["wa2"] + p["ba2"]
    logp = jax.nn.log_softmax(logits, axis=-1)
    hc = jnp.maximum(state @ p["wc1"] + p["bc1"], 0.0)
    value = hc @ p["wc2"] + p["bc2"]
    return logp, value


if __name__ == "__main__":
    key = jax.random.PRNGKey(0)
    k_param, k_state = jax.random.split(key)

    s_nvals, a_nvals, hidden_size = 16, 4, 32
    batch = 8

    params = init_params(k_param, s_nvals, a_nvals, hidden_size)
    fused = fuse_params(params)          # one-time weight fusion (not per call)
    state = jax.random.normal(k_state, (batch, s_nvals), dtype=jnp.float32)

    logp, value = actor_critic_forward(state, fused)
    logp, value = jax.block_until_ready((logp, value))

    ref_logp, ref_value = _reference(state, params)
    assert logp.shape == (batch, a_nvals) and value.shape == (batch, 1)
    np.testing.assert_allclose(np.asarray(logp), np.asarray(ref_logp), atol=1e-5, rtol=1e-5)
    np.testing.assert_allclose(np.asarray(value), np.asarray(ref_value), atol=1e-5, rtol=1e-5)

    # Exercise the batch-tiled / padded path once as well (multi-step grid).
    big_state = jax.random.normal(k_state, (2500, s_nvals), dtype=jnp.float32)
    blp, bval = jax.block_until_ready(actor_critic_forward(big_state, fused))
    rlp, rval = _reference(big_state, params)
    np.testing.assert_allclose(np.asarray(blp), np.asarray(rlp), atol=1e-5, rtol=1e-5)
    np.testing.assert_allclose(np.asarray(bval), np.asarray(rval), atol=1e-5, rtol=1e-5)

    print("KERNEL_OK")
</pallas_src>

<mosaic_0001>
module attributes {stable_mosaic.version = 11 : i64} {
  func.func @_ac_fused_kernel(%arg0: i32, %arg1: memref<8x16xf32, #tpu.memory_space<vmem>>, %arg2: memref<16x64xf32, #tpu.memory_space<vmem>>, %arg3: memref<1x64xf32, #tpu.memory_space<vmem>>, %arg4: memref<64x128xf32, #tpu.memory_space<vmem>>, %arg5: memref<1x128xf32, #tpu.memory_space<vmem>>, %arg6: memref<8x128xf32, #tpu.memory_space<vmem>>) attributes {dimension_semantics = [#tpu.dimension_semantics<parallel>], iteration_bounds = array<i64: 1>, scalar_prefetch = 0 : i64, scratch_operands = 0 : i64, tpu.core_type = #tpu.core_type<tc>, window_params = [{transform_indices = @transform_0, window_bounds = array<i64: 8, 16>}, {pipeline_mode = #tpu.pipeline_mode<synchronous>, transform_indices = @transform_1, window_bounds = array<i64: 16, 64>}, {pipeline_mode = #tpu.pipeline_mode<synchronous>, transform_indices = @transform_2, window_bounds = array<i64: 1, 64>}, {pipeline_mode = #tpu.pipeline_mode<synchronous>, transform_indices = @transform_3, window_bounds = array<i64: 64, 128>}, {pipeline_mode = #tpu.pipeline_mode<synchronous>, transform_indices = @transform_4, window_bounds = array<i64: 1, 128>}, {transform_indices = @transform_5, window_bounds = array<i64: 8, 128>}]} {
    %c0 = arith.constant 0 : index
    %c0_0 = arith.constant 0 : index
    %0 = vector.load %arg1[%c0, %c0_0] : memref<8x16xf32, #tpu.memory_space<vmem>>, vector<8x16xf32>
    %c0_1 = arith.constant 0 : index
    %c0_2 = arith.constant 0 : index
    %1 = vector.load %arg2[%c0_1, %c0_2] : memref<16x64xf32, #tpu.memory_space<vmem>>, vector<16x64xf32>
    %cst = arith.constant dense<0.000000e+00> : vector<8x64xf32>
    %2 = tpu.matmul %0, %1, %cst {dimension_numbers = #tpu.dot_dimension_numbers<[1], [0], [0], [1], [0, 0, 1, 1], [], []>} : vector<8x16xf32>, vector<16x64xf32>, vector<8x64xf32> -> vector<8x64xf32>
    %c0_3 = arith.constant 0 : index
    %c0_4 = arith.constant 0 : index
    %3 = vector.load %arg3[%c0_3, %c0_4] : memref<1x64xf32, #tpu.memory_space<vmem>>, vector<1x64xf32>
    %4 = vector.broadcast %3 : vector<1x64xf32> to vector<8x64xf32>
    %5 = arith.addf %2, %4 : vector<8x64xf32>
    %cst_5 = arith.constant 0.000000e+00 : f32
    %6 = vector.broadcast %cst_5 : f32 to vector<8x64xf32>
    %7 = arith.maximumf %5, %6 : vector<8x64xf32>
    %c0_6 = arith.constant 0 : index
    %c0_7 = arith.constant 0 : index
    %8 = vector.load %arg4[%c0_6, %c0_7] : memref<64x128xf32, #tpu.memory_space<vmem>>, vector<64x128xf32>
    %cst_8 = arith.constant dense<0.000000e+00> : vector<8x128xf32>
    %9 = tpu.matmul %7, %8, %cst_8 {dimension_numbers = #tpu.dot_dimension_numbers<[1], [0], [0], [1], [0, 0, 1, 1], [], []>} : vector<8x64xf32>, vector<64x128xf32>, vector<8x128xf32> -> vector<8x128xf32>
    %c0_9 = arith.constant 0 : index
    %c0_10 = arith.constant 0 : index
    %10 = vector.load %arg5[%c0_9, %c0_10] : memref<1x128xf32, #tpu.memory_space<vmem>>, vector<1x128xf32>
    %11 = vector.broadcast %10 : vector<1x128xf32> to vector<8x128xf32>
    %12 = arith.addf %9, %11 : vector<8x128xf32>
    %13 = tpu.iota {dimensions = array<i32: 1>} : vector<8x128xi32>
    %c4_i32 = arith.constant 4 : i32
    %14 = vector.broadcast %c4_i32 : i32 to vector<8x128xi32>
    %15 = arith.cmpi slt, %13, %14 : vector<8x128xi32>
    %cst_11 = arith.constant 0xFF800000 : f32
    %16 = vector.broadcast %cst_11 : f32 to vector<8x128xf32>
    %17 = arith.select %15, %12, %16 : vector<8x128xi1>, vector<8x128xf32>
    %cst_12 = arith.constant dense<0xFF800000> : vector<8xf32>
    %18 = vector.multi_reduction <maximumf>, %17, %cst_12 [1] : vector<8x128xf32> to vector<8xf32>
    %19 = vector.shape_cast %18 : vector<8xf32> to vector<8x1xf32>
    %20 = vector.broadcast %19 : vector<8x1xf32> to vector<8x128xf32>
    %21 = arith.subf %12, %20 : vector<8x128xf32>
    %22 = math.exp %21 : vector<8x128xf32>
    %cst_13 = arith.constant 0.000000e+00 : f32
    %23 = vector.broadcast %cst_13 : f32 to vector<8x128xf32>
    %24 = arith.select %15, %22, %23 : vector<8x128xi1>, vector<8x128xf32>
    %cst_14 = arith.constant dense<0.000000e+00> : vector<8xf32>
    %25 = vector.multi_reduction <add>, %24, %cst_14 [1] : vector<8x128xf32> to vector<8xf32>
    %26 = vector.shape_cast %25 : vector<8xf32> to vector<8x1xf32>
    %27 = math.log %26 : vector<8x1xf32>
    %28 = vector.broadcast %27 : vector<8x1xf32> to vector<8x128xf32>
    %29 = arith.subf %21, %28 : vector<8x128xf32>
    %30 = arith.select %15, %29, %12 : vector<8x128xi1>, vector<8x128xf32>
    %c0_15 = arith.constant 0 : index
    %c0_16 = arith.constant 0 : index
    %31 = vector.load %arg6[%c0_15, %c0_16] : memref<8x128xf32, #tpu.memory_space<vmem>>, vector<8x128xf32>
    tpu.vector_store %arg6[%c0_15, %c0_16], %30 {strides = array<i32>} : memref<8x128xf32, #tpu.memory_space<vmem>>, vector<8x128xf32>,
    return
  }
  func.func @transform_0(%arg0: i32) -> (i32, i32) {
    %c0_i32 = arith.constant 0 : i32
    %c0_i32_0 = arith.constant 0 : i32
    return %arg0, %c0_i32 : i32, i32
  }
  func.func @transform_1(%arg0: i32) -> (i32, i32) {
    %c0_i32 = arith.constant 0 : i32
    %c0_i32_0 = arith.constant 0 : i32
    %c0_i32_1 = arith.constant 0 : i32
    return %c0_i32, %c0_i32_0 : i32, i32
  }
  func.func @transform_2(%arg0: i32) -> (i32, i32) {
    %c0_i32 = arith.constant 0 : i32
    %c0_i32_0 = arith.constant 0 : i32
    %c0_i32_1 = arith.constant 0 : i32
    return %c0_i32, %c0_i32_0 : i32, i32
  }
  func.func @transform_3(%arg0: i32) -> (i32, i32) {
    %c0_i32 = arith.constant 0 : i32
    %c0_i32_0 = arith.constant 0 : i32
    %c0_i32_1 = arith.constant 0 : i32
    return %c0_i32, %c0_i32_0 : i32, i32
  }
  func.func @transform_4(%arg0: i32) -> (i32, i32) {
    %c0_i32 = arith.constant 0 : i32
    %c0_i32_0 = arith.constant 0 : i32
    %c0_i32_1 = arith.constant 0 : i32
    return %c0_i32, %c0_i32_0 : i32, i32
  }
  func.func @transform_5(%arg0: i32) -> (i32, i32) {
    %c0_i32 = arith.constant 0 : i32
    %c0_i32_0 = arith.constant 0 : i32
    return %arg0, %c0_i32 : i32, i32
  }
}

</mosaic_0001>

<bundles_post_ra>
// kernel: _forward_impl.1
= control target key start
LH: loop header
LB: loop body
LE: loop exit
PB: predicated region body
PF: predicated region fallthrough
CT: control target
= control target key end

     0   :  { %10 = vsyncpa [#allocation3], 0  ;;  %s431_s0 = inlined_call_operand.hbm [shape: f32[8,16], index: 0, kind: input, shape index: {}]   ;;  %s432_s1 = inlined_call_operand.hbm [shape: f32[16,64], index: 1, kind: input, shape index: {}]   ;;  %s433_s2 = inlined_call_operand.vmem [shape: f32[1,64], index: 2, kind: input, shape index: {}]   ;;  %s434_s3 = inlined_call_operand.hbm [shape: f32[64,128], index: 3, kind: input, shape index: {}]   ;;  %s435_s4 = inlined_call_operand.vmem [shape: f32[1,128], index: 4, kind: input, shape index: {}]   ;;  %s436_s5 = inlined_call_operand.vmem [shape: f32[8,128], index: 5, kind: output, shape index: {}]  }
   0x1   :  { %11 = vsyncpa [#allocation5], 0  ;;  %s373_s18 = smov [#allocation4]  }
   0x2   :  { %s27_s19 = sshll.u32 %s373_s18, 4  ;;  %s28_s19 = int_to_ptr.vmem [resolvable:$true] %s27_s19 }
   0x3   :  { %s317_s20 = scalar_lea.vmem %s28_s19, 256  ;;  %p322_p1 = scmp.lt.s32.totalorder %s28_s19, %s28_s19 }
   0x4   :  { %p318_p0 = scmp.ne.s32.totalorder %s28_s19, %s317_s20  ;;  %p323_p2 = scmp.lt.s32.totalorder %s317_s20, %s317_s20 }
   0x6   :  { %p324_p3 = por %p323_p2, %p322_p1 }
   0x8   :  { %p325_p4 = pnand %p324_p3, %p318_p0 }
   0xa   :  { %328 = shalt.err (!%p325_p4)
}
   0xb   :  { %s374_s21 = smov 128   ;;  %s375_s22 = smov 8  }
   0xc   :  { %33 = dma.hbm_to_vmem [thread:$0]  %s432_s1, 256, %s28_s19, [#allocation5], %s374_s21, %s374_s21, %s375_s22  }
   0xd   :  { %s376_s25 = smov [#allocation2]   ;;  %s377_s27 = smov [#allocation6]  }
   0xe   :  { %s18_s26 = sshll.u32 %s376_s25, 4  ;;  %s41_s28 = sshll.u32 %s377_s27, 4  ;;  %s19_s26 = int_to_ptr.vmem [resolvable:$true] %s18_s26  ;;  %s42_s28 = int_to_ptr.vmem [resolvable:$true] %s41_s28 }
   0xf   :  { %s337_s29 = scalar_lea.vmem %s19_s26, 128  ;;  %p342_p6 = scmp.lt.s32.totalorder %s19_s26, %s19_s26 }
  0x10   :  { %p338_p5 = scmp.ne.s32.totalorder %s19_s26, %s337_s29  ;;  %p343_p7 = scmp.lt.s32.totalorder %s337_s29, %s337_s29 }
  0x12   :  { %p344_p8 = por %p343_p7, %p342_p6 }
  0x14   :  { %p345_p9 = pnand %p344_p8, %p338_p5 }
  0x16   :  { %348 = shalt.err (!%p345_p9)
}
  0x17   :  { %21 = dma.hbm_to_vmem [thread:$0]  %s431_s0, 128, %s19_s26, [#allocation3]  }
  0x18   :  { %s357_s7 = scalar_lea.vmem %s42_s28, 1024  ;;  %p362_p11 = scmp.lt.s32.totalorder %s42_s28, %s42_s28 }
  0x19   :  { %p358_p10 = scmp.ne.s32.totalorder %s42_s28, %s357_s7  ;;  %p363_p12 = scmp.lt.s32.totalorder %s357_s7, %s357_s7 }
  0x1b   :  { %p364_p13 = por %p363_p12, %p362_p11 }
  0x1d   :  { %p365_p0 = pnand %p364_p13, %p358_p10 }
  0x1f   :  { %368 = shalt.err (!%p365_p0)
}
  0x20   :  { %47 = dma.hbm_to_vmem [thread:$0]  %s434_s3, 1024, %s42_s28, [#allocation5], %s374_s21, %s374_s21, %s375_s22  }
  0x21   :  { %369 = dma.done.wait [#allocation3], 128  }
  0x22   :  { %370 = vsyncadd [#allocation3], 4294967168 }
  0x23   :  { %371 = dma.done.wait [#allocation5], 1280  }
  0x24   :  { %372 = vsyncadd [#allocation5], 4294966016  ;;  %v378_v0 = vmov 0.0   ;;  %vm379_vm0 = vmmov 0   ;;  %v61_v1 = vld [vmem:[#allocation4 + $0x8] sm:$0xff]  ;;  %v60_v2 = vld [vmem:[#allocation4] sm:$0xff]  ;;  %v233_v17 = vlaneseq }
  0x25   :  { %272 = vmatprep.subr.mxu0 %v378_v0  ;;  %276 = vmatprep.mubr.msk.f32.mxu0 %vm379_vm0, %v378_v0  ;;  %v59_v3 = vld [vmem:[#allocation2] sm:$0xff]  ;;  %vm69_vm1 = vcmask 130048   ;;  %v151_v4 = vld [vmem:[#allocation6 + $0x38] sm:$0xff]  ;;  %v150_v5 = vld [vmem:[#allocation6 + $0x30] sm:$0xff]  ;;  %vm159_vm2 = vcmask 523264  }
  0x26   :  { %279 = vmatprep.subr.mxu1 %v378_v0  ;;  %295 = vmatprep.mubr.msk.f32.mxu1 %vm379_vm0, %v378_v0  ;;  %v149_v6 = vld [vmem:[#allocation6 + $0x28] sm:$0xff]  ;;  %v148_v7 = vld [vmem:[#allocation6 + $0x20] sm:$0xff]  ;;  %v147_v8 = vld [vmem:[#allocation6 + $0x18] sm:$0xff]  ;;  %v234_v18 = vand.u32 127, %v233_v17 }
  0x27   :  { %273 = vmatpush3.msra.mxu0 %v61_v1  ;;  %280 = vmatpush3.msra.mxu1 %v151_v4  ;;  %v146_v9 = vld [vmem:[#allocation6 + $0x10] sm:$0xff]  ;;  %v145_v10 = vld [vmem:[#allocation6 + $0x8] sm:$0xff]  ;;  %v144_v11 = vld [vmem:[#allocation6] sm:$0xff] }
  0x28   :  { %274 = vmatprep.subr.mxu0 %v378_v0  ;;  %281 = vmatprep.subr.mxu1 %v378_v0  ;;  %v256_v12 = vld [vmem:[%s433_s2] ss:$0 sm:$0xff]  ;;  %vm235_vm3 = vcmp.lt.s32.totalorder %v234_v18, 4 }
  0x29   :  { %275 = vmatpush3.msra.mxu0 %v60_v2  ;;  %282 = vmatpush3.msra.mxu1 %v150_v5  ;;  %v258_v19 = vld [vmem:[%s435_s4] ss:$0 sm:$0xff] }
  0x2a   :  { %277 = vmatmul.mubr.msk.f32.vlgmr.msra.gmra.mxu0 %vm69_vm1, %v59_v3  ;;  %283 = vmatprep.subr.mxu1 %v378_v0 }
  0x2b   :  { %284 = vmatpush3.msra.mxu1 %v149_v6 }
  0x2c   :  { %285 = vmatprep.subr.mxu1 %v378_v0 }
  0x2d   :  { %286 = vmatpush3.msra.mxu1 %v148_v7 }
  0x2e   :  { %287 = vmatprep.subr.mxu1 %v378_v0 }
  0x2f   :  { %288 = vmatpush3.msra.mxu1 %v147_v8 }
  0x30   :  { %289 = vmatprep.subr.mxu1 %v378_v0 }
  0x31   :  { %290 = vmatpush3.msra.mxu1 %v146_v9 }
  0x32   :  { %291 = vmatprep.subr.mxu1 %v378_v0 }
  0x33   :  { %292 = vmatpush3.msra.mxu1 %v145_v10 }
  0x34   :  { %293 = vmatprep.subr.mxu1 %v378_v0 }
  0x35   :  { %294 = vmatpush3.msra.mxu1 %v144_v11 }
  0xea   :  { %v139_v13 = vpop.f32.mrf.mxu0 }
  0xeb   :  { %v140_v14 = vadd.f32 %v256_v12, %v139_v13 }
  0xec   :  { %v278_v15 = vpop.f32.mrf.mxu0 }
  0xed   :  { %v143_v16 = vmax.f32 %v140_v14, 0.0 }
  0xef   :  { %296 = vmatmul.mubr.msk.f32.vlgmr.msra.gmra.mxu1 %vm159_vm2, %v143_v16 }
 0x1af   :  { %v229_v20 = vpop.f32.mrf.mxu1 }
 0x1b0   :  { %v230_v21 = vadd.f32 %v258_v19, %v229_v20 }
 0x1b1   :  { %v297_v22 = vpop.f32.mrf.mxu1 }
 0x1b2   :  { %v236_v23 = vsel %vm235_vm3, %v230_v21, -inf }
 0x1b3   :  { %237 = vmax.xlane.f32.xlu0 %v236_v23 }
 0x23c   :  { %v238_v24 = vpop.xlane.xlu0 %237 }
 0x23d   :  { %v239_v25 = vsub.f32 %v230_v21, %v238_v24 }
 0x23f   :  { %v240_v26 = vmul.f32 1.442695, %v239_v25 }
 0x241   :  { %305 = vpow2.f32 %v240_v26 }
 0x24e   :  { %v306_v27 = vpop.eup %305 }
 0x24f   :  { %v242_v28 = vsel %vm235_vm3, %v306_v27, 0.0 }
 0x250   :  { %243 = vadd.xlane.f32.xlu0 %v242_v28 }
 0x2d9   :  { %v244_v29 = vpop.xlane.xlu0 %243 }
 0x2da   :  { %307 = vlog2.f32 %v244_v29 }
 0x2e7   :  { %v308_v30 = vpop.eup %307 }
 0x2e8   :  { %v246_v31 = vmul.f32 0.6931472, %v308_v30 }
 0x2ea   :  { %v247_v32 = vsub.f32 %v239_v25, %v246_v31 }
 0x2ec   :  { %v248_v33 = vsel %vm235_vm3, %v247_v32, %v230_v21 }
 0x2ed   :  { %249 = vst [vmem:[%s436_s5] sm:$0xff] %v248_v33 }
 0x2ee   :  { %254 = vsyncpa [#allocation3], 1 }
 0x2ef   :  { %255 = vsyncpa [#allocation5], 1 }

</bundles_post_ra>
